<compile_context>
chip_gen: v7x
topology: tpu7x:2x2x1
jax: 0.10.0
libtpu: 0.0.40
codegen_flags: <defaults>
</compile_context>

<pallas_src>
import jax
import jax.numpy as jnp
from jax.experimental import pallas as pl
from jax.experimental.pallas import tpu as pltpu


_NEG_SLOPE = 0.01   # PyTorch nn.LeakyReLU default
_LANE = 128


def _leaky_relu(x, negative_slope=_NEG_SLOPE):
    # slope in (0,1) -> max(x, slope*x) == LeakyReLU(x); avoids the compare+select.
    return jnp.maximum(x, negative_slope * x)


def _round_up(n, m):
    return ((n + m - 1) // m) * m


def gating_kernel(x_ref,
                  w1_ref, b1_ref,
                  w2_ref, b2_ref,
                  w3_ref, b3_ref,
                  w4_ref, b4_ref,
                  out_ref):
    # ---- layer1 + ReLU (K=4: VPU broadcast FMAs, skip the MXU). dropout1 -> identity.
    x = x_ref[...]                                    # (tb, 4) f32
    h32 = b1_ref[...]                                 # (1, 128) f32, broadcasts up
    for k in range(x_ref.shape[1]):                   # static K=4 unrolled loop
        h32 = h32 + x[:, k:k + 1] * w1_ref[k:k + 1, :]
    h = jnp.maximum(h32, 0.0).astype(jnp.bfloat16)    # carry bf16 forward

    # ---- layer2 + LeakyReLU. bf16 operands, f32 accumulation. dropout2 -> identity.
    h32 = jnp.dot(h, w2_ref[...], preferred_element_type=jnp.float32) + b2_ref[...]
    h = _leaky_relu(h32).astype(jnp.bfloat16)

    # ---- layer3 + LeakyReLU. bf16 operands, f32 accumulation. dropout3 -> identity.
    h32 = jnp.dot(h, w3_ref[...], preferred_element_type=jnp.float32) + b3_ref[...]
    h = _leaky_relu(h32).astype(jnp.bfloat16)

    # ---- layer4 (expert dim lane-padded to 128) + softmax over the expert axis.
    logits = jnp.dot(h, w4_ref[...], preferred_element_type=jnp.float32) + b4_ref[...]
    m = jnp.max(logits, axis=-1, keepdims=True)
    e = jnp.exp(logits - m)                           # padded cols: exp(-huge) -> 0
    denom = jnp.sum(e, axis=-1, keepdims=True)
    out_ref[...] = e / denom                          # exact normalization


def gating_forward(x, params, *, block_b=2048):
    """x: (B, input_dim) float32. params: dict from init_params (f32, PyTorch-style)."""
    B, input_dim = x.shape
    num_experts = params["w4"].shape[1]

    # Lane-pad the expert dim -> unmasked (lane-dense) output stores.
    e_pad = _round_up(num_experts, _LANE)
    w4 = params["w4"]
    b4 = params["b4"]
    if e_pad != num_experts:
        w4 = jnp.pad(w4, ((0, 0), (0, e_pad - num_experts)))
        # Huge negative f32 bias on padded columns: exp underflows to 0 after max-sub.
        b4 = jnp.pad(b4, ((0, 0), (0, e_pad - num_experts)), constant_values=-1e30)

    # bf16 MXU operands for all three wide matmuls (f32 accumulation inside the kernel).
    w2 = params["w2"].astype(jnp.bfloat16)
    w3 = params["w3"].astype(jnp.bfloat16)
    w4 = w4.astype(jnp.bfloat16)                      # b4 stays f32

    # Batch tiling: big tiles amortize per-step overhead; cap at ceil(B/2) so large
    # batches always give >= 2 grid steps (both v7x TensorCores busy).
    tb = max(8, min(block_b, _round_up((B + 1) // 2, 8)))
    b_pad = _round_up(B, tb)
    if b_pad != B:
        x = jnp.pad(x, ((0, b_pad - B), (0, 0)))
    grid = (b_pad // tb,)

    args = (x,
            params["w1"], params["b1"],
            w2, params["b2"],
            w3, params["b3"],
            w4, b4)

    def resident(a):
        # Same block every grid step -> stays VMEM-resident across the whole grid.
        return pl.BlockSpec(a.shape, lambda i: tuple(0 for _ in a.shape))

    in_specs = [pl.BlockSpec((tb, input_dim), lambda i: (i, 0))] + \
               [resident(a) for a in args[1:]]

    flops = 2 * b_pad * (input_dim * 128 + 128 * 256 + 256 * 128 + 128 * e_pad)
    bytes_accessed = (int(x.size) * 4 + b_pad * e_pad * 4
                      + sum(int(a.size) * a.dtype.itemsize for a in args[1:]))
    cost = pl.CostEstimate(flops=flops,
                           transcendentals=b_pad * e_pad,
                           bytes_accessed=bytes_accessed)

    out = pl.pallas_call(
        gating_kernel,
        out_shape=jax.ShapeDtypeStruct((b_pad, e_pad), jnp.float32),
        grid=grid,
        in_specs=in_specs,
        out_specs=pl.BlockSpec((tb, e_pad), lambda i: (i, 0)),
        compiler_params=pltpu.CompilerParams(
            dimension_semantics=("parallel",),
            vmem_limit_bytes=32 << 20),   # > v5e's 16 MiB default; == v6e/v7x default
        cost_estimate=cost,
    )(*args)

    return out[:B, :num_experts]


def init_params(key, input_dim, num_experts):
    """PyTorch-style uniform(-1/sqrt(fan_in), 1/sqrt(fan_in)) init.

    Weights stored as (in_features, out_features); biases as (1, out_features).
    """
    dims = [(input_dim, 128), (128, 256), (256, 128), (128, num_experts)]
    params = {}
    for idx, (fan_in, fan_out) in enumerate(dims, start=1):
        key, kw, kb = jax.random.split(key, 3)
        bound = 1.0 / (fan_in ** 0.5)
        params[f"w{idx}"] = jax.random.uniform(
            kw, (fan_in, fan_out), jnp.float32, minval=-bound, maxval=bound)
        params[f"b{idx}"] = jax.random.uniform(
            kb, (1, fan_out), jnp.float32, minval=-bound, maxval=bound)
    return params


def gating_reference(x, params):
    """Pure-JAX f32 reference of the same forward pass (eval-mode dropout)."""
    h = jnp.maximum(x @ params["w1"] + params["b1"], 0.0)
    h = _leaky_relu(h @ params["w2"] + params["b2"])
    h = _leaky_relu(h @ params["w3"] + params["b3"])
    logits = h @ params["w4"] + params["b4"]
    return jax.nn.softmax(logits, axis=1)


if __name__ == "__main__":
    input_dim = 4
    num_experts = 8
    batch = 2

    key = jax.random.PRNGKey(0)
    key, kx = jax.random.split(key)
    x = jax.random.normal(kx, (batch, input_dim), jnp.float32)
    params = init_params(key, input_dim, num_experts)

    out = gating_forward(x, params)
    out = jax.block_until_ready(out)

    ref = gating_reference(x, params)
    assert out.shape == (batch, num_experts)
    # bf16 MXU operands on layers 2-4 -> loosened tolerance vs the pure-f32 reference.
    assert jnp.allclose(out, ref, atol=2e-2, rtol=2e-2), "mismatch vs pure-JAX reference"
    assert jnp.allclose(jnp.sum(out, axis=1), 1.0, atol=1e-3), "softmax rows must sum to 1"

    print("KERNEL_OK")
</pallas_src>

<mosaic_0001>
module attributes {stable_mosaic.version = 11 : i64} {
  func.func @gating_kernel(%arg0: i32, %arg1: memref<8x4xf32, #tpu.memory_space<vmem>>, %arg2: memref<4x128xf32, #tpu.memory_space<vmem>>, %arg3: memref<1x128xf32, #tpu.memory_space<vmem>>, %arg4: memref<128x256xbf16, #tpu.memory_space<vmem>>, %arg5: memref<1x256xf32, #tpu.memory_space<vmem>>, %arg6: memref<256x128xbf16, #tpu.memory_space<vmem>>, %arg7: memref<1x128xf32, #tpu.memory_space<vmem>>, %arg8: memref<128x128xbf16, #tpu.memory_space<vmem>>, %arg9: memref<1x128xf32, #tpu.memory_space<vmem>>, %arg10: memref<8x128xf32, #tpu.memory_space<vmem>>) attributes {dimension_semantics = [#tpu.dimension_semantics<parallel>], iteration_bounds = array<i64: 1>, scalar_prefetch = 0 : i64, scratch_operands = 0 : i64, tpu.core_type = #tpu.core_type<tc>, window_params = [{transform_indices = @transform_0, window_bounds = array<i64: 8, 4>}, {pipeline_mode = #tpu.pipeline_mode<synchronous>, transform_indices = @transform_1, window_bounds = array<i64: 4, 128>}, {pipeline_mode = #tpu.pipeline_mode<synchronous>, transform_indices = @transform_2, window_bounds = array<i64: 1, 128>}, {pipeline_mode = #tpu.pipeline_mode<synchronous>, transform_indices = @transform_3, window_bounds = array<i64: 128, 256>}, {pipeline_mode = #tpu.pipeline_mode<synchronous>, transform_indices = @transform_4, window_bounds = array<i64: 1, 256>}, {pipeline_mode = #tpu.pipeline_mode<synchronous>, transform_indices = @transform_5, window_bounds = array<i64: 256, 128>}, {pipeline_mode = #tpu.pipeline_mode<synchronous>, transform_indices = @transform_6, window_bounds = array<i64: 1, 128>}, {pipeline_mode = #tpu.pipeline_mode<synchronous>, transform_indices = @transform_7, window_bounds = array<i64: 128, 128>}, {pipeline_mode = #tpu.pipeline_mode<synchronous>, transform_indices = @transform_8, window_bounds = array<i64: 1, 128>}, {transform_indices = @transform_9, window_bounds = array<i64: 8, 128>}]} {
    %c0 = arith.constant 0 : index
    %c0_0 = arith.constant 0 : index
    %0 = vector.load %arg1[%c0, %c0_0] : memref<8x4xf32, #tpu.memory_space<vmem>>, vector<8x4xf32>
    %c0_1 = arith.constant 0 : index
    %c0_2 = arith.constant 0 : index
    %1 = vector.load %arg3[%c0_1, %c0_2] : memref<1x128xf32, #tpu.memory_space<vmem>>, vector<1x128xf32>
    %2 = vector.extract_strided_slice %0 {offsets = [0, 0], sizes = [8, 1], strides = [1, 1]} : vector<8x4xf32> to vector<8x1xf32>
    %c0_3 = arith.constant 0 : index
    %c0_4 = arith.constant 0 : index
    %3 = vector.load %arg2[%c0_3, %c0_4] : memref<4x128xf32, #tpu.memory_space<vmem>>, vector<1x128xf32>
    %4 = vector.broadcast %2 : vector<8x1xf32> to vector<8x128xf32>
    %5 = vector.broadcast %3 : vector<1x128xf32> to vector<8x128xf32>
    %6 = arith.mulf %4, %5 : vector<8x128xf32>
    %7 = vector.broadcast %1 : vector<1x128xf32> to vector<8x128xf32>
    %8 = arith.addf %7, %6 : vector<8x128xf32>
    %9 = vector.extract_strided_slice %0 {offsets = [0, 1], sizes = [8, 1], strides = [1, 1]} : vector<8x4xf32> to vector<8x1xf32>
    %c1 = arith.constant 1 : index
    %c0_5 = arith.constant 0 : index
    %10 = vector.load %arg2[%c1, %c0_5] : memref<4x128xf32, #tpu.memory_space<vmem>>, vector<1x128xf32>
    %11 = vector.broadcast %9 : vector<8x1xf32> to vector<8x128xf32>
    %12 = vector.broadcast %10 : vector<1x128xf32> to vector<8x128xf32>
    %13 = arith.mulf %11, %12 : vector<8x128xf32>
    %14 = arith.addf %8, %13 : vector<8x128xf32>
    %15 = vector.extract_strided_slice %0 {offsets = [0, 2], sizes = [8, 1], strides = [1, 1]} : vector<8x4xf32> to vector<8x1xf32>
    %c2 = arith.constant 2 : index
    %c0_6 = arith.constant 0 : index
    %16 = vector.load %arg2[%c2, %c0_6] : memref<4x128xf32, #tpu.memory_space<vmem>>, vector<1x128xf32>
    %17 = vector.broadcast %15 : vector<8x1xf32> to vector<8x128xf32>
    %18 = vector.broadcast %16 : vector<1x128xf32> to vector<8x128xf32>
    %19 = arith.mulf %17, %18 : vector<8x128xf32>
    %20 = arith.addf %14, %19 : vector<8x128xf32>
    %21 = vector.extract_strided_slice %0 {offsets = [0, 3], sizes = [8, 1], strides = [1, 1]} : vector<8x4xf32> to vector<8x1xf32>
    %c3 = arith.constant 3 : index
    %c0_7 = arith.constant 0 : index
    %22 = vector.load %arg2[%c3, %c0_7] : memref<4x128xf32, #tpu.memory_space<vmem>>, vector<1x128xf32>
    %23 = vector.broadcast %21 : vector<8x1xf32> to vector<8x128xf32>
    %24 = vector.broadcast %22 : vector<1x128xf32> to vector<8x128xf32>
    %25 = arith.mulf %23, %24 : vector<8x128xf32>
    %26 = arith.addf %20, %25 : vector<8x128xf32>
    %cst = arith.constant 0.000000e+00 : f32
    %27 = vector.broadcast %cst : f32 to vector<8x128xf32>
    %28 = arith.maximumf %26, %27 : vector<8x128xf32>
    %29 = arith.truncf %28 : vector<8x128xf32> to vector<8x128xbf16>
    %c0_8 = arith.constant 0 : index
    %c0_9 = arith.constant 0 : index
    %30 = vector.load %arg4[%c0_8, %c0_9] : memref<128x256xbf16, #tpu.memory_space<vmem>>, vector<128x256xbf16>
    %cst_10 = arith.constant dense<0.000000e+00> : vector<8x256xf32>
    %31 = tpu.matmul %29, %30, %cst_10 {dimension_numbers = #tpu.dot_dimension_numbers<[1], [0], [0], [1], [0, 0, 1, 1], [], []>} : vector<8x128xbf16>, vector<128x256xbf16>, vector<8x256xf32> -> vector<8x256xf32>
    %c0_11 = arith.constant 0 : index
    %c0_12 = arith.constant 0 : index
    %32 = vector.load %arg5[%c0_11, %c0_12] : memref<1x256xf32, #tpu.memory_space<vmem>>, vector<1x256xf32>
    %33 = vector.broadcast %32 : vector<1x256xf32> to vector<8x256xf32>
    %34 = arith.addf %31, %33 : vector<8x256xf32>
    %cst_13 = arith.constant 0.00999999977 : f32
    %35 = vector.broadcast %cst_13 : f32 to vector<8x256xf32>
    %36 = arith.mulf %35, %34 : vector<8x256xf32>
    %37 = arith.maximumf %34, %36 : vector<8x256xf32>
    %38 = arith.truncf %37 : vector<8x256xf32> to vector<8x256xbf16>
    %c0_14 = arith.constant 0 : index
    %c0_15 = arith.constant 0 : index
    %39 = vector.load %arg6[%c0_14, %c0_15] : memref<256x128xbf16, #tpu.memory_space<vmem>>, vector<256x128xbf16>
    %cst_16 = arith.constant dense<0.000000e+00> : vector<8x128xf32>
    %40 = tpu.matmul %38, %39, %cst_16 {dimension_numbers = #tpu.dot_dimension_numbers<[1], [0], [0], [1], [0, 0, 1, 1], [], []>} : vector<8x256xbf16>, vector<256x128xbf16>, vector<8x128xf32> -> vector<8x128xf32>
    %c0_17 = arith.constant 0 : index
    %c0_18 = arith.constant 0 : index
    %41 = vector.load %arg7[%c0_17, %c0_18] : memref<1x128xf32, #tpu.memory_space<vmem>>, vector<1x128xf32>
    %42 = vector.broadcast %41 : vector<1x128xf32> to vector<8x128xf32>
    %43 = arith.addf %40, %42 : vector<8x128xf32>
    %cst_19 = arith.constant 0.00999999977 : f32
    %44 = vector.broadcast %cst_19 : f32 to vector<8x128xf32>
    %45 = arith.mulf %44, %43 : vector<8x128xf32>
    %46 = arith.maximumf %43, %45 : vector<8x128xf32>
    %47 = arith.truncf %46 : vector<8x128xf32> to vector<8x128xbf16>
    %c0_20 = arith.constant 0 : index
    %c0_21 = arith.constant 0 : index
    %48 = vector.load %arg8[%c0_20, %c0_21] : memref<128x128xbf16, #tpu.memory_space<vmem>>, vector<128x128xbf16>
    %cst_22 = arith.constant dense<0.000000e+00> : vector<8x128xf32>
    %49 = tpu.matmul %47, %48, %cst_22 {dimension_numbers = #tpu.dot_dimension_numbers<[1], [0], [0], [1], [0, 0, 1, 1], [], []>} : vector<8x128xbf16>, vector<128x128xbf16>, vector<8x128xf32> -> vector<8x128xf32>
    %c0_23 = arith.constant 0 : index
    %c0_24 = arith.constant 0 : index
    %50 = vector.load %arg9[%c0_23, %c0_24] : memref<1x128xf32, #tpu.memory_space<vmem>>, vector<1x128xf32>
    %51 = vector.broadcast %50 : vector<1x128xf32> to vector<8x128xf32>
    %52 = arith.addf %49, %51 : vector<8x128xf32>
    %cst_25 = arith.constant dense<0xFF800000> : vector<8xf32>
    %53 = vector.multi_reduction <maximumf>, %52, %cst_25 [1] : vector<8x128xf32> to vector<8xf32>
    %54 = vector.shape_cast %53 : vector<8xf32> to vector<8x1xf32>
    %55 = vector.broadcast %54 : vector<8x1xf32> to vector<8x128xf32>
    %56 = arith.subf %52, %55 : vector<8x128xf32>
    %57 = math.exp %56 : vector<8x128xf32>
    %cst_26 = arith.constant dense<0.000000e+00> : vector<8xf32>
    %58 = vector.multi_reduction <add>, %57, %cst_26 [1] : vector<8x128xf32> to vector<8xf32>
    %59 = vector.shape_cast %58 : vector<8xf32> to vector<8x1xf32>
    %60 = vector.broadcast %59 : vector<8x1xf32> to vector<8x128xf32>
    %61 = arith.divf %57, %60 : vector<8x128xf32>
    %c0_27 = arith.constant 0 : index
    %c0_28 = arith.constant 0 : index
    %62 = vector.load %arg10[%c0_27, %c0_28] : memref<8x128xf32, #tpu.memory_space<vmem>>, vector<8x128xf32>
    tpu.vector_store %arg10[%c0_27, %c0_28], %61 {strides = array<i32>} : memref<8x128xf32, #tpu.memory_space<vmem>>, vector<8x128xf32>,
    return
  }
  func.func @transform_0(%arg0: i32) -> (i32, i32) {
    %c0_i32 = arith.constant 0 : i32
    %c0_i32_0 = arith.constant 0 : i32
    return %arg0, %c0_i32 : i32, i32
  }
  func.func @transform_1(%arg0: i32) -> (i32, i32) {
    %c0_i32 = arith.constant 0 : i32
    %c0_i32_0 = arith.constant 0 : i32
    %c0_i32_1 = arith.constant 0 : i32
    return %c0_i32, %c0_i32_0 : i32, i32
  }
  func.func @transform_2(%arg0: i32) -> (i32, i32) {
    %c0_i32 = arith.constant 0 : i32
    %c0_i32_0 = arith.constant 0 : i32
    %c0_i32_1 = arith.constant 0 : i32
    return %c0_i32, %c0_i32_0 : i32, i32
  }
  func.func @transform_3(%arg0: i32) -> (i32, i32) {
    %c0_i32 = arith.constant 0 : i32
    %c0_i32_0 = arith.constant 0 : i32
    %c0_i32_1 = arith.constant 0 : i32
    return %c0_i32, %c0_i32_0 : i32, i32
  }
  func.func @transform_4(%arg0: i32) -> (i32, i32) {
    %c0_i32 = arith.constant 0 : i32
    %c0_i32_0 = arith.constant 0 : i32
    %c0_i32_1 = arith.constant 0 : i32
    return %c0_i32, %c0_i32_0 : i32, i32
  }
  func.func @transform_5(%arg0: i32) -> (i32, i32) {
    %c0_i32 = arith.constant 0 : i32
    %c0_i32_0 = arith.constant 0 : i32
    %c0_i32_1 = arith.constant 0 : i32
    return %c0_i32, %c0_i32_0 : i32, i32
  }
  func.func @transform_6(%arg0: i32) -> (i32, i32) {
    %c0_i32 = arith.constant 0 : i32
    %c0_i32_0 = arith.constant 0 : i32
    %c0_i32_1 = arith.constant 0 : i32
    return %c0_i32, %c0_i32_0 : i32, i32
  }
  func.func @transform_7(%arg0: i32) -> (i32, i32) {
    %c0_i32 = arith.constant 0 : i32
    %c0_i32_0 = arith.constant 0 : i32
    %c0_i32_1 = arith.constant 0 : i32
    return %c0_i32, %c0_i32_0 : i32, i32
  }
  func.func @transform_8(%arg0: i32) -> (i32, i32) {
    %c0_i32 = arith.constant 0 : i32
    %c0_i32_0 = arith.constant 0 : i32
    %c0_i32_1 = arith.constant 0 : i32
    return %c0_i32, %c0_i32_0 : i32, i32
  }
  func.func @transform_9(%arg0: i32) -> (i32, i32) {
    %c0_i32 = arith.constant 0 : i32
    %c0_i32_0 = arith.constant 0 : i32
    return %arg0, %c0_i32 : i32, i32
  }
}

</mosaic_0001>

<bundles_post_ra>
// kernel: tpu_custom_call.1
= control target key start
LH: loop header
LB: loop body
LE: loop exit
PB: predicated region body
PF: predicated region fallthrough
CT: control target
= control target key end

     0   :  { %14 = vsyncpa [#allocation3], 0  ;;  %s1008_s0 = inlined_call_operand.vmem [shape: f32[8,4], index: 0, kind: input, shape index: {}]   ;;  %s1009_s1 = inlined_call_operand.vmem [shape: f32[4,128], index: 1, kind: input, shape index: {}]   ;;  %s1010_s2 = inlined_call_operand.vmem [shape: f32[1,128], index: 2, kind: input, shape index: {}]   ;;  %s1011_s3 = inlined_call_operand.hbm [shape: bf16[128,256], index: 3, kind: input, shape index: {}]   ;;  %s1012_s4 = inlined_call_operand.vmem [shape: f32[1,256], index: 4, kind: input, shape index: {}]   ;;  %s1013_s5 = inlined_call_operand.hbm [shape: bf16[256,128], index: 5, kind: input, shape index: {}]   ;;  %s1014_s6 = inlined_call_operand.vmem [shape: f32[1,128], index: 6, kind: input, shape index: {}]   ;;  %s1015_s7 = inlined_call_operand.hbm [shape: bf16[128,128], index: 7, kind: input, shape index: {}]   ;;  %s1016_s8 = inlined_call_operand.vmem [shape: f32[1,128], index: 8, kind: input, shape index: {}]   ;;  %s1017_s9 = inlined_call_operand.hbm [shape: f32[8,128], index: 9, kind: output, shape index: {}]  }
   0x1   :  { %15 = vsyncpa [#allocation6], 0 }
   0x2   :  { %16 = vsyncpa [#allocation4], 0  ;;  %s863_s30 = smov [#allocation5]   ;;  %s769_s13 = scalar_lea.hbm %s1013_s5, 2048 }
   0x3   :  { %s42_s10 = sshll.u32 %s863_s30, 4  ;;  %p770_p0 = scmp.ne.s32.totalorder %s1013_s5, %s769_s13  ;;  %s43_s10 = int_to_ptr.vmem [resolvable:$true] %s42_s10 }
   0x4   :  { %p773_p1 = scmp.lt.u32.totalorder %s769_s13, %s1013_s5 }
   0x6   :  { %p775_p2 = pnand %p773_p1, %p770_p0 }
   0x8   :  { %778 = shalt.err (!%p775_p2)
}
   0x9   :  { %s779_s18 = scalar_lea.vmem %s43_s10, 2048  ;;  %p784_p4 = scmp.lt.s32.totalorder %s43_s10, %s43_s10 }
   0xa   :  { %p780_p3 = scmp.ne.s32.totalorder %s43_s10, %s779_s18  ;;  %p785_p5 = scmp.lt.s32.totalorder %s779_s18, %s779_s18 }
   0xc   :  { %p786_p6 = por %p785_p5, %p784_p4 }
   0xe   :  { %p787_p7 = pnand %p786_p6, %p780_p3 }
  0x10   :  { %790 = shalt.err (!%p787_p7)
}
  0x11   :  { %s864_s19 = smov 64   ;;  %s865_s20 = smov 4  }
  0x12   :  { %48 = dma.hbm_to_vmem [thread:$0]  %s1013_s5, 2048, %s43_s10, [#allocation6], %s864_s19, %s864_s19, %s865_s20  }
  0x13   :  { %s866_s23 = smov [#allocation2]   ;;  %s791_s27 = scalar_lea.hbm %s1011_s3, 2048 }
  0x14   :  { %s28_s24 = sshll.u32 %s866_s23, 4  ;;  %p792_p8 = scmp.ne.s32.totalorder %s1011_s3, %s791_s27  ;;  %s29_s24 = int_to_ptr.vmem [resolvable:$true] %s28_s24 }
  0x15   :  { %p795_p9 = scmp.lt.u32.totalorder %s791_s27, %s1011_s3 }
  0x17   :  { %p797_p10 = pnand %p795_p9, %p792_p8 }
  0x19   :  { %800 = shalt.err (!%p797_p10)
}
  0x1a   :  { %s801_s12 = scalar_lea.vmem %s29_s24, 2048  ;;  %p806_p12 = scmp.lt.s32.totalorder %s29_s24, %s29_s24 }
  0x1b   :  { %p802_p11 = scmp.ne.s32.totalorder %s29_s24, %s801_s12  ;;  %p807_p13 = scmp.lt.s32.totalorder %s801_s12, %s801_s12 }
  0x1d   :  { %p808_p0 = por %p807_p13, %p806_p12 }
  0x1f   :  { %p809_p1 = pnand %p808_p0, %p802_p11 }
  0x21   :  { %812 = shalt.err (!%p809_p1)
}
  0x22   :  { %s867_s5 = smov 128   ;;  %s868_s10 = smov 8  }
  0x23   :  { %34 = dma.hbm_to_vmem [thread:$0]  %s1011_s3, 2048, %s29_s24, [#allocation3], %s867_s5, %s867_s5, %s868_s10  }
  0x24   :  { %s869_s15 = smov [#allocation7]   ;;  %s813_s21 = scalar_lea.hbm %s1015_s7, 1024 }
  0x25   :  { %s56_s16 = sshll.u32 %s869_s15, 4  ;;  %p814_p2 = scmp.ne.s32.totalorder %s1015_s7, %s813_s21  ;;  %s57_s16 = int_to_ptr.vmem [resolvable:$true] %s56_s16 }
  0x26   :  { %p817_p3 = scmp.lt.u32.totalorder %s813_s21, %s1015_s7 }
  0x28   :  { %p819_p4 = pnand %p817_p3, %p814_p2 }
  0x2a   :  { %822 = shalt.err (!%p819_p4)
}
  0x2b   :  { %s823_s27 = scalar_lea.vmem %s57_s16, 1024  ;;  %p828_p6 = scmp.lt.s32.totalorder %s57_s16, %s57_s16 }
  0x2c   :  { %p824_p5 = scmp.ne.s32.totalorder %s57_s16, %s823_s27  ;;  %p829_p7 = scmp.lt.s32.totalorder %s823_s27, %s823_s27 }
  0x2e   :  { %p830_p8 = por %p829_p7, %p828_p6 }
  0x30   :  { %p831_p9 = pnand %p830_p8, %p824_p5 }
  0x32   :  { %834 = shalt.err (!%p831_p9)
}
  0x33   :  { %62 = dma.hbm_to_vmem [thread:$0]  %s1015_s7, 1024, %s57_s16, [#allocation6], %s864_s19, %s864_s19, %s865_s20  }
  0x34   :  { %857 = dma.done.wait [#allocation3], 2048  }
  0x35   :  { %858 = vsyncadd [#allocation3], 4294965248 }
  0x36   :  { %859 = dma.done.wait [#allocation6], 3072  }
  0x37   :  { %860 = vsyncadd [#allocation6], 4294964224  ;;  %v870_v0 = vmov 0   ;;  %v871_v1 = vmov 2   ;;  %v75_v2 = vld [vmem:[%s1008_s0] sm:$0xff]  ;;  %v872_v7 = vmov 1   ;;  %v148_v62 = vlaneseq }
  0x38   :  { %712 = vset.pattern.permute.xlu0 %v870_v0  ;;  %714 = vset.pattern.permute.xlu1 %v871_v1  ;;  %v717_v3 = vld [vmem:[#allocation2 + $0x4] ss:$8 sps:$4 sm:$0xff]   ;;  %v719_v4 = vld [vmem:[#allocation2] ss:$8 sps:$4 sm:$0xff]   ;;  %v720_v5 = vld [vmem:[#allocation2 + $0x14] ss:$8 sps:$4 sm:$0xff]  }
  0x39   :  { %270 = vmatprep.mubr.bf16.mxu0 %v870_v0  ;;  %80 = vperm.xlu0 %712, %v75_v2   ;;  %v722_v6 = vld [vmem:[#allocation2 + $0x10] ss:$8 sps:$4 sm:$0xff]   ;;  %v873_v8 = vmov 3   ;;  %v723_v9 = vld [vmem:[#allocation2 + $0x24] ss:$8 sps:$4 sm:$0xff]   ;;  %v874_v57 = vmov 0.0  }
  0x3a   :  { %108 = vperm.xlu1 %714, %v75_v2   ;;  %238 = vmatprep.subr.bf16.mxu0 %v717_v3  ;;  %v725_v10 = vld [vmem:[#allocation2 + $0x20] ss:$8 sps:$4 sm:$0xff]   ;;  %v726_v11 = vld [vmem:[#allocation2 + $0x34] ss:$8 sps:$4 sm:$0xff]   ;;  %v728_v12 = vld [vmem:[#allocation2 + $0x30] ss:$8 sps:$4 sm:$0xff]  }
  0x3b   :  { %239 = vmatpush1.bf16.msra.mxu0 %v719_v4  ;;  %v729_v13 = vld [vmem:[#allocation2 + $0x44] ss:$8 sps:$4 sm:$0xff]   ;;  %v731_v14 = vld [vmem:[#allocation2 + $0x40] ss:$8 sps:$4 sm:$0xff]   ;;  %v732_v15 = vld [vmem:[#allocation2 + $0x54] ss:$8 sps:$4 sm:$0xff]  }
  0x3c   :  { %240 = vmatprep.subr.bf16.mxu0 %v720_v5  ;;  %v741_v16 = vld [vmem:[#allocation5 + $0x40] sm:$0xff]   ;;  %v743_v18 = vld [vmem:[#allocation5 + $0x48] sm:$0xff]   ;;  %v734_v19 = vld [vmem:[#allocation2 + $0x50] ss:$8 sps:$4 sm:$0xff]   ;;  %v149_v63 = vshrl.u32 %v148_v62, 7  ;;  %vm875_vm0 = vmmov 0  }
  0x3d   :  { %713 = vset.pattern.permute.xlu0 %v872_v7  ;;  %v742_v17 = vld [vmem:[#allocation5] sm:$0xff]   ;;  %647 = vmatprep.subr.bf16.mxu1 %v741_v16  ;;  %v744_v21 = vld [vmem:[#allocation5 + $0x8] sm:$0xff]   ;;  %v745_v23 = vld [vmem:[#allocation5 + $0x50] sm:$0xff]  }
  0x3e   :  { %715 = vset.pattern.permute.xlu1 %v873_v8  ;;  %97 = vperm.xlu0 %713, %v75_v2   ;;  %v735_v20 = vld [vmem:[#allocation2 + $0x64] ss:$8 sps:$4 sm:$0xff]   ;;  %v737_v22 = vld [vmem:[#allocation2 + $0x60] ss:$8 sps:$4 sm:$0xff]   ;;  %v738_v24 = vld [vmem:[#allocation2 + $0x74] ss:$8 sps:$4 sm:$0xff]  }
  0x3f   :  { %119 = vperm.xlu1 %715, %v75_v2   ;;  %241 = vmatpush1.bf16.msra.mxu0 %v722_v6  ;;  %v746_v25 = vld [vmem:[#allocation5 + $0x10] sm:$0xff]   ;;  %v747_v26 = vld [vmem:[#allocation5 + $0x58] sm:$0xff]   ;;  %v749_v29 = vld [vmem:[#allocation5 + $0x60] sm:$0xff]   ;;  %v150_v0 = vsub.s32 0, %v149_v63  ;;  %v154_v2 = vsub.s32 1, %v149_v63 }
  0x40   :  { %242 = vmatprep.subr.bf16.mxu0 %v723_v9  ;;  %648 = vmatpush3.bf16.msra.mxu1 %v742_v17  ;;  %v740_v27 = vld [vmem:[#allocation2 + $0x70] ss:$8 sps:$4 sm:$0xff]   ;;  %v750_v30 = vld [vmem:[#allocation5 + $0x20] sm:$0xff]   ;;  %v751_v31 = vld [vmem:[#allocation5 + $0x68] sm:$0xff]  }
  0x41   :  { %649 = vmatprep.subr.bf16.mxu1 %v743_v18  ;;  %v748_v28 = vld [vmem:[#allocation5 + $0x18] sm:$0xff]   ;;  %v600_v32 = vld [vmem:[%s1009_s1] ss:$0 sm:$0xff]  ;;  %v602_v37 = vld [vmem:[%s1009_s1 + $0x1] ss:$0 sm:$0xff] }
  0x42   :  { %716 = vset.pattern.permute.xlu0 %v873_v8  ;;  %v601_v36 = vld [vmem:[%s1010_s2] ss:$0 sm:$0xff]  ;;  %v603_v38 = vld [vmem:[%s1009_s1 + $0x2] ss:$0 sm:$0xff]  ;;  %v604_v40 = vld [vmem:[%s1009_s1 + $0x3] ss:$0 sm:$0xff] }
  0x43   :  { %243 = vmatpush1.bf16.msra.mxu0 %v725_v10  ;;  %v752_v51 = vld [vmem:[#allocation5 + $0x28] sm:$0xff]   ;;  %v753_v52 = vld [vmem:[#allocation5 + $0x70] sm:$0xff]   ;;  %v755_v54 = vld [vmem:[#allocation5 + $0x78] sm:$0xff]  }
  0x44   :  { %244 = vmatprep.subr.bf16.mxu0 %v726_v11  ;;  %650 = vmatpush3.bf16.msra.mxu1 %v744_v21  ;;  %v754_v53 = vld [vmem:[#allocation5 + $0x30] sm:$0xff]   ;;  %v756_v55 = vld [vmem:[#allocation5 + $0x38] sm:$0xff]   ;;  %v757_v56 = vld [vmem:[#allocation7] sm:$0xff]  }
  0x45   :  { %651 = vmatprep.subr.bf16.mxu1 %v745_v23  ;;  %v758_v58 = vld [vmem:[#allocation7 + $0x8] sm:$0xff]   ;;  %v759_v59 = vld [vmem:[#allocation7 + $0x10] sm:$0xff]   ;;  %v760_v60 = vld [vmem:[#allocation7 + $0x18] sm:$0xff]  }
  0x46   :  { %v761_v61 = vld [vmem:[#allocation7 + $0x20] sm:$0xff]   ;;  %v146_v1 = vld [vmem:[%s1012_s4] sm:$0x3]  ;;  %v762_v17 = vld [vmem:[#allocation7 + $0x28] sm:$0xff]  }
  0x47   :  { %245 = vmatpush1.bf16.msra.mxu0 %v728_v12  ;;  %v151_v3 = vrot.slane %v146_v1, %v150_v0  ;;  %v155_v4 = vrot.slane %v146_v1, %v154_v2  ;;  %v763_v18 = vld [vmem:[#allocation7 + $0x30] sm:$0xff]  }
  0x48   :  { %246 = vmatprep.subr.bf16.mxu0 %v729_v13  ;;  %652 = vmatpush3.bf16.msra.mxu1 %v746_v25  ;;  %v621_v21 = vld [vmem:[%s1014_s6] ss:$0 sm:$0xff]  ;;  %s876_s6 = smov [#allocation8]  }
  0x49   :  { %653 = vmatprep.subr.bf16.mxu1 %v747_v26  ;;  %s590_s17 = sshll.u32 %s876_s6, 4  ;;  %s591_s17 = int_to_ptr.vmem [resolvable:$true] %s590_s17 }
  0x4a   :  { %p840_p11 = scmp.lt.s32.totalorder %s591_s17, %s591_s17 }
  0x4b   :  { %247 = vmatpush1.bf16.msra.mxu0 %v731_v14 }
  0x4c   :  { %248 = vmatprep.subr.bf16.mxu0 %v732_v15  ;;  %654 = vmatpush3.bf16.msra.mxu1 %v748_v28 }
  0x4d   :  { %655 = vmatprep.subr.bf16.mxu1 %v749_v29 }
  0x4f   :  { %249 = vmatpush1.bf16.msra.mxu0 %v734_v19  ;;  %v764_v19 = vld [vmem:[#allocation7 + $0x38] sm:$0xff]  }
  0x50   :  { %250 = vmatprep.subr.bf16.mxu0 %v735_v20  ;;  %656 = vmatpush3.bf16.msra.mxu1 %v750_v30  ;;  %v638_v30 = vld [vmem:[%s1016_s8] ss:$0 sm:$0xff]  ;;  %s835_s8 = scalar_lea.vmem %s591_s17, 128 }
  0x51   :  { %657 = vmatprep.subr.bf16.mxu1 %v751_v31  ;;  %p836_p10 = scmp.ne.s32.totalorder %s591_s17, %s835_s8  ;;  %p841_p12 = scmp.lt.s32.totalorder %s835_s8, %s835_s8 }
  0x53   :  { %251 = vmatpush1.bf16.msra.mxu0 %v737_v22  ;;  %p842_p13 = por %p841_p12, %p840_p11 }
  0x54   :  { %252 = vmatprep.subr.bf16.mxu0 %v738_v24  ;;  %658 = vmatpush3.bf16.msra.mxu1 %v752_v51 }
  0x55   :  { %659 = vmatprep.subr.bf16.mxu1 %v753_v52  ;;  %p843_p0 = pnand %p842_p13, %p836_p10 }
  0x57   :  { %253 = vmatpush1.bf16.msra.mxu0 %v740_v27 }
  0x58   :  { %660 = vmatpush3.bf16.msra.mxu1 %v754_v53  ;;  %678 = vmatprep.subr.bf16.mxu0 %v874_v57 }
  0x59   :  { %661 = vmatprep.subr.bf16.mxu1 %v755_v54 }
  0x5c   :  { %662 = vmatpush3.bf16.msra.mxu1 %v756_v55 }
  0xb8   :  { %v81_v33 = vpop.permute.xlu0 %80 }
  0xb9   :  { %v109_v34 = vpop.permute.xlu1 %108  ;;  %v87_v35 = vmul.f32 %v600_v32, %v81_v33 }
  0xba   :  { %v115_v44 = vmul.f32 %v603_v38, %v109_v34 }
  0xbb   :  { %v94_v42 = vadd.f32 %v601_v36, %v87_v35 }
  0xbd   :  { %v98_v39 = vpop.permute.xlu0 %97 }
  0xbe   :  { %v120_v41 = vpop.permute.xlu1 %119  ;;  %v104_v43 = vmul.f32 %v602_v37, %v98_v39 }
  0xbf   :  { %v126_v46 = vmul.f32 %v604_v40, %v120_v41 }
  0xc0   :  { %v105_v45 = vadd.f32 %v104_v43, %v94_v42 }
  0xc2   :  { %v116_v47 = vadd.f32 %v115_v44, %v105_v45 }
  0xc4   :  { %v127_v48 = vadd.f32 %v126_v46, %v116_v47 }
  0xc6   :  { %v128_v49 = vmax.f32 %v127_v48, 0.0 }
  0xc8   :  { %v129_v50 = vpack.c.bf16 %v128_v49, %v128_v49 }
  0xca   :  { %271 = vmatmul.mubr.bf16.vlgmr.msra.gmra.mrb[0].mxu0 %v129_v50 }
  0xcb   :  { %679 = vmatpush3.bf16.msra.mxu0 %v757_v56  ;;  %694 = vmatprep.mubr.msk.bf16.mxu0 %vm875_vm0, %v874_v57 }
  0xcc   :  { %680 = vmatprep.subr.bf16.mxu0 %v874_v57 }
  0xcf   :  { %681 = vmatpush3.bf16.msra.mxu0 %v758_v58 }
  0xd0   :  { %682 = vmatprep.subr.bf16.mxu0 %v874_v57 }
  0xd3   :  { %683 = vmatpush3.bf16.msra.mxu0 %v759_v59 }
  0xd4   :  { %684 = vmatprep.subr.bf16.mxu0 %v874_v57 }
  0xd7   :  { %685 = vmatpush3.bf16.msra.mxu0 %v760_v60 }
  0xd8   :  { %686 = vmatprep.subr.bf16.mxu0 %v874_v57 }
  0xdb   :  { %687 = vmatpush3.bf16.msra.mxu0 %v761_v61 }
  0xdc   :  { %688 = vmatprep.subr.bf16.mxu0 %v874_v57 }
  0xdf   :  { %689 = vmatpush3.bf16.msra.mxu0 %v762_v17 }
  0xe0   :  { %690 = vmatprep.subr.bf16.mxu0 %v874_v57 }
  0xe3   :  { %691 = vmatpush3.bf16.msra.mxu0 %v763_v18 }
  0xe4   :  { %692 = vmatprep.subr.bf16.mxu0 %v874_v57 }
  0xe7   :  { %693 = vmatpush3.bf16.msra.mxu0 %v764_v19 }
 0x19d   :  { %v272_v5 = vpop.f32.mrb[0].mxu0 }
 0x19e   :  { %v273_v6 = vadd.f32 %v272_v5, %v151_v3  ;;  %v274_v7 = vpop.f32.mrb[1].mxu0 }
 0x19f   :  { %v275_v8 = vadd.f32 %v274_v7, %v155_v4  ;;  %v276_v9 = vpop.f32.mrb[2].mxu0 }
 0x1a0   :  { %v279_v10 = vmul.f32 0.01, %v273_v6  ;;  %v277_v11 = vpop.f32.mrb[3].mxu0 }
 0x1a1   :  { %v280_v12 = vmul.f32 0.01, %v275_v8 }
 0x1a2   :  { %v281_v13 = vmax.f32 %v273_v6, %v279_v10 }
 0x1a3   :  { %v282_v14 = vmax.f32 %v275_v8, %v280_v12 }
 0x1a4   :  { %v283_v16 = vpack.c.bf16 %v281_v13, %v281_v13 }
 0x1a5   :  { %v284_v15 = vpack.c.bf16 %v282_v14, %v282_v14 }
 0x1a7   :  { %452 = vmatprep.mubr.bf16.mxu1 %v284_v15 }
 0x1a8   :  { %453 = vmatmul.mubr.bf16.vlgmr.msra.gmra.mrb[0].mxu1 %v283_v16 }
 0x27b   :  { %v663_v20 = vpop.f32.mrb[0].mxu1 }
 0x27c   :  { %v664_v22 = vpop.f32.mrb[1].mxu1 }
 0x27d   :  { %v665_v23 = vadd.f32 %v664_v22, %v663_v20  ;;  %v666_v24 = vpop.f32.mrb[2].mxu1 }
 0x27e   :  { %v667_v25 = vpop.f32.mrb[3].mxu1 }
 0x27f   :  { %v455_v26 = vadd.f32 %v665_v23, %v621_v21 }
 0x281   :  { %v460_v27 = vmul.f32 0.01, %v455_v26 }
 0x283   :  { %v461_v28 = vmax.f32 %v455_v26, %v460_v27 }
 0x285   :  { %v462_v29 = vpack.c.bf16 %v461_v28, %v461_v28 }
 0x287   :  { %695 = vmatmul.mubr.bf16.vlgmr.msra.gmra.mrb[4].mxu0 %v462_v29 }
 0x35a   :  { %v568_v31 = vpop.f32.mrb[4].mxu0 }
 0x35b   :  { %v569_v32 = vadd.f32 %v638_v30, %v568_v31  ;;  %v696_v33 = vpop.f32.mrb[5].mxu0 }
 0x35c   :  { %v571_v34 = vpop.f32.mrb[6].mxu0 }
 0x35d   :  { %574 = vmax.xlane.f32.xlu1 %v569_v32  ;;  %v697_v35 = vpop.f32.mrb[7].mxu0 }
 0x3ea   :  { %v575_v36 = vpop.xlane.xlu1 %574 }
 0x3eb   :  { %v576_v37 = vsub.f32 %v569_v32, %v575_v36 }
 0x3ed   :  { %v577_v38 = vmul.f32 1.442695, %v576_v37 }
 0x3ef   :  { %765 = vpow2.f32 %v577_v38 }
 0x3f9   :  { %v766_v39 = vpop.eup %765 }
 0x3fa   :  { %579 = vadd.xlane.f32.xlu0 %v766_v39 }
 0x487   :  { %v580_v40 = vpop.xlane.xlu0 %579 }
 0x488   :  { %767 = vrcp.f32 %v580_v40 }
 0x492   :  { %v768_v41 = vpop.eup %767 }
 0x493   :  { %v582_v42 = vmul.f32 %v768_v41, %v766_v39 }
 0x495   :  { %583 = vst [vmem:[#allocation8] sm:$0xff] %v582_v42 }
 0x496   :  { %846 = shalt.err (!%p843_p0)
}
 0x497   :  { %s847_s22 = scalar_lea.hbm %s1017_s9, 128 }
 0x498   :  { %p848_p1 = scmp.ne.s32.totalorder %s1017_s9, %s847_s22  ;;  %p851_p2 = scmp.lt.u32.totalorder %s847_s22, %s1017_s9 }
 0x49a   :  { %p853_p3 = pnand %p851_p2, %p848_p1 }
 0x49c   :  { %856 = shalt.err (!%p853_p3)
}
 0x49d   :  { %593 = dma.vmem_to_hbm [thread:$0]  %s591_s17, 128, %s1017_s9, [#allocation4]  }
 0x49e   :  { %861 = dma.done.wait [#allocation4], 128  }
 0x49f   :  { %862 = vsyncadd [#allocation4], 4294967168 }
 0x4a0   :  { %597 = vsyncpa [#allocation3], 1 }
 0x4a1   :  { %598 = vsyncpa [#allocation6], 1 }
 0x4a2   :  { %599 = vsyncpa [#allocation4], 1 }

</bundles_post_ra>
